<compile_context>
chip_gen: v7x
topology: tpu7x:2x2x1
jax: 0.10.0
libtpu: 0.0.40
codegen_flags: <defaults>
</compile_context>

<pallas_src>
import jax
import jax.numpy as jnp
from jax.experimental import pallas as pl
from jax.experimental.pallas import tpu as pltpu

HIDDEN = 50        # logical hidden width from the PyTorch spec
LANE = 128         # TPU lane width: hidden / padded-logit dims use this
SUBLANE = 8
NEG_INF = -1e30    # bias fill for padded classes -> exp() underflows to 0


def _round_up(x, m):
    return (x + m - 1) // m * m


def _cdiv(a, b):
    return -(-a // b)


def _mlp_kernel(x_ref, w1_ref, b1_ref, w2_ref, b2_ref, o_ref):
    # layer1: Linear + ReLU (MXU matmul, f32 accumulate)
    x = x_ref[...]                                                   # (TB, in_dim)
    h = jnp.dot(x, w1_ref[...], preferred_element_type=jnp.float32) + b1_ref[...]
    h = jnp.maximum(h, 0.0)                                          # (TB, H_PAD)
    # layer2: Linear + numerically-stable Softmax over the last dim.
    # Padded logit columns carry bias = NEG_INF, so exp(z - max) == 0 there and
    # the softmax normalizes over the real `output_dim` classes only.
    z = jnp.dot(h, w2_ref[...], preferred_element_type=jnp.float32) + b2_ref[...]
    z = z - jnp.max(z, axis=-1, keepdims=True)
    e = jnp.exp(z)
    # Exact reciprocal: keeps row sums == 1 (approx=True broke the tolerance),
    # and the EUP/VALU slots have slack here so it costs nothing measurable.
    inv = pl.reciprocal(jnp.sum(e, axis=-1, keepdims=True), approx=False)
    p = e * inv                                                      # (TB, O_PAD)
    # Narrow store: only the first o_store lanes (real classes + a few zeros)
    # go to HBM; the 128-wide padding never leaves VMEM.
    o_store = o_ref.shape[-1]
    o_ref[...] = p[:, :o_store].astype(o_ref.dtype)                  # (TB, O_STORE)


def prepare_params(w1, b1, w2, b2):
    """Pad params lane-dense once (hoisted out of the per-call path).

    Returns (w1p, b1p, w2p, b2p) with hidden padded 50->128 and the output
    logit dim padded to 128 (padded columns get bias = -1e30).
    """
    in_dim = w1.shape[0]
    out_dim = w2.shape[1]
    h_pad = _round_up(HIDDEN, LANE)        # 50 -> 128
    o_pad = _round_up(out_dim, LANE)       # 3  -> 128
    w1p = jnp.zeros((in_dim, h_pad), jnp.float32).at[:, :HIDDEN].set(w1)
    b1p = jnp.zeros((1, h_pad), jnp.float32).at[:, :HIDDEN].set(b1)
    w2p = jnp.zeros((h_pad, o_pad), jnp.float32).at[:HIDDEN, :out_dim].set(w2)
    b2p = jnp.full((1, o_pad), NEG_INF, jnp.float32).at[:, :out_dim].set(b2)
    return w1p, b1p, w2p, b2p


def three_layers_net_forward(x, padded_params, out_dim, *, block_batch=None):
    """Forward of three_layers_net (ReLU hidden, softmax output).

    x            : (B, input_dim) f32
    padded_params: output of prepare_params(w1, b1, w2, b2)
    Returns (B, out_dim) f32 softmax probabilities.
    """
    w1p, b1p, w2p, b2p = padded_params
    B, in_dim = x.shape
    h_pad = w1p.shape[1]
    o_pad = w2p.shape[1]
    o_store = _round_up(out_dim, SUBLANE)     # 3 -> 8 stored lanes

    # ---- batch tiling: minimize padding, amortize per-step overhead --------
    if block_batch is None:
        # Even split into ceil(B/1024) steps keeps b_pad/B ~ 1 while keeping
        # tiles big enough (~>=512 rows) to sit near the HBM roofline.
        # v7x note: for B >= ~512 pass block_batch=cdiv(B, 2) (rounded to 8)
        # so both TensorCores get a "parallel" grid step; skip on v5e/v6e.
        n_steps = max(1, _cdiv(B, 1024))
        block_batch = _cdiv(B, n_steps)
    tb = _round_up(block_batch, SUBLANE)
    b_pad = _round_up(max(B, tb), tb)
    xp = x if b_pad == B else jnp.zeros((b_pad, in_dim), jnp.float32).at[:B].set(x)

    grid = (b_pad // tb,)
    grid_spec = pltpu.PrefetchScalarGridSpec(
        num_scalar_prefetch=0,
        grid=grid,
        in_specs=[
            pl.BlockSpec((tb, in_dim), lambda i: (i, 0)),     # x: batch-tiled
            pl.BlockSpec((in_dim, h_pad), lambda i: (0, 0)),  # weights/biases stay
            pl.BlockSpec((1, h_pad), lambda i: (0, 0)),       # VMEM-resident across
            pl.BlockSpec((h_pad, o_pad), lambda i: (0, 0)),   # all grid steps
            pl.BlockSpec((1, o_pad), lambda i: (0, 0)),
        ],
        out_specs=pl.BlockSpec((tb, o_store), lambda i: (i, 0)),
    )

    cost = pl.CostEstimate(
        flops=2 * b_pad * (in_dim * h_pad + h_pad * o_pad),
        transcendentals=b_pad * o_pad,                        # exp per padded logit
        bytes_accessed=4 * (xp.size + w1p.size + b1p.size + w2p.size + b2p.size
                            + b_pad * o_store),
    )

    out_narrow = pl.pallas_call(
        _mlp_kernel,
        out_shape=jax.ShapeDtypeStruct((b_pad, o_store), jnp.float32),
        grid_spec=grid_spec,
        # Per-step live set (x tile ~16 KB, weights ~66 KB, narrow out tile,
        # double-buffered) is well under the default scoped VMEM on every
        # generation incl. v7x's 32/64 MiB, so no vmem_limit_bytes override.
        compiler_params=pltpu.CompilerParams(dimension_semantics=("parallel",)),
        cost_estimate=cost,
    )(xp, w1p, b1p, w2p, b2p)

    return out_narrow[:B, :out_dim]


def init_params(key, input_dim, output_dim):
    """Deterministic PyTorch-style Linear init: U(-1/sqrt(fan_in), +1/sqrt(fan_in))."""
    k1, k2, k3, k4 = jax.random.split(key, 4)
    bound1 = 1.0 / jnp.sqrt(float(input_dim))
    bound2 = 1.0 / jnp.sqrt(float(HIDDEN))
    w1 = jax.random.uniform(k1, (input_dim, HIDDEN), jnp.float32, -bound1, bound1)
    b1 = jax.random.uniform(k2, (1, HIDDEN), jnp.float32, -bound1, bound1)
    w2 = jax.random.uniform(k3, (HIDDEN, output_dim), jnp.float32, -bound2, bound2)
    b2 = jax.random.uniform(k4, (1, output_dim), jnp.float32, -bound2, bound2)
    return w1, b1, w2, b2


def _reference(x, w1, b1, w2, b2):
    h = jnp.maximum(x @ w1 + b1, 0.0)
    return jax.nn.softmax(h @ w2 + b2, axis=-1)


if __name__ == "__main__":
    key = jax.random.PRNGKey(0)
    k_x, k_p = jax.random.split(key)

    # Iris-like shapes; B=32 with block_batch=16 exercises a 2-step batch grid.
    B, INPUT_DIM, OUTPUT_DIM = 32, 4, 3
    x = jax.random.normal(k_x, (B, INPUT_DIM), dtype=jnp.float32)
    w1, b1, w2, b2 = init_params(k_p, INPUT_DIM, OUTPUT_DIM)

    # Pad weights once (hoisted out of the per-call path).
    padded = prepare_params(w1, b1, w2, b2)

    out = three_layers_net_forward(x, padded, OUTPUT_DIM, block_batch=16)
    out = jax.block_until_ready(out)

    ref = _reference(x, w1, b1, w2, b2)
    assert out.shape == (B, OUTPUT_DIM)
    # Exact-reciprocal softmax: tight tolerances again.
    assert jnp.allclose(out, ref, atol=1e-5, rtol=1e-5), float(jnp.max(jnp.abs(out - ref)))
    assert jnp.allclose(jnp.sum(out, axis=-1), jnp.ones((B,)), atol=1e-5)

    print("KERNEL_OK")
</pallas_src>

<mosaic_0001>
module attributes {stable_mosaic.version = 11 : i64} {
  func.func @_mlp_kernel(%arg0: i32, %arg1: memref<16x4xf32, #tpu.memory_space<vmem>>, %arg2: memref<4x128xf32, #tpu.memory_space<vmem>>, %arg3: memref<1x128xf32, #tpu.memory_space<vmem>>, %arg4: memref<128x128xf32, #tpu.memory_space<vmem>>, %arg5: memref<1x128xf32, #tpu.memory_space<vmem>>, %arg6: memref<16x8xf32, #tpu.memory_space<vmem>>) attributes {dimension_semantics = [#tpu.dimension_semantics<parallel>], iteration_bounds = array<i64: 2>, scalar_prefetch = 0 : i64, scratch_operands = 0 : i64, tpu.core_type = #tpu.core_type<tc>, window_params = [{transform_indices = @transform_0, window_bounds = array<i64: 16, 4>}, {pipeline_mode = #tpu.pipeline_mode<synchronous>, transform_indices = @transform_1, window_bounds = array<i64: 4, 128>}, {pipeline_mode = #tpu.pipeline_mode<synchronous>, transform_indices = @transform_2, window_bounds = array<i64: 1, 128>}, {pipeline_mode = #tpu.pipeline_mode<synchronous>, transform_indices = @transform_3, window_bounds = array<i64: 128, 128>}, {pipeline_mode = #tpu.pipeline_mode<synchronous>, transform_indices = @transform_4, window_bounds = array<i64: 1, 128>}, {transform_indices = @transform_5, window_bounds = array<i64: 16, 8>}]} {
    %c0 = arith.constant 0 : index
    %c0_0 = arith.constant 0 : index
    %0 = vector.load %arg1[%c0, %c0_0] : memref<16x4xf32, #tpu.memory_space<vmem>>, vector<16x4xf32>
    %c0_1 = arith.constant 0 : index
    %c0_2 = arith.constant 0 : index
    %1 = vector.load %arg2[%c0_1, %c0_2] : memref<4x128xf32, #tpu.memory_space<vmem>>, vector<4x128xf32>
    %cst = arith.constant dense<0.000000e+00> : vector<16x128xf32>
    %2 = tpu.matmul %0, %1, %cst {dimension_numbers = #tpu.dot_dimension_numbers<[1], [0], [0], [1], [0, 0, 1, 1], [], []>} : vector<16x4xf32>, vector<4x128xf32>, vector<16x128xf32> -> vector<16x128xf32>
    %c0_3 = arith.constant 0 : index
    %c0_4 = arith.constant 0 : index
    %3 = vector.load %arg3[%c0_3, %c0_4] : memref<1x128xf32, #tpu.memory_space<vmem>>, vector<1x128xf32>
    %4 = vector.broadcast %3 : vector<1x128xf32> to vector<16x128xf32>
    %5 = arith.addf %2, %4 : vector<16x128xf32>
    %cst_5 = arith.constant 0.000000e+00 : f32
    %6 = vector.broadcast %cst_5 : f32 to vector<16x128xf32>
    %7 = arith.maximumf %5, %6 : vector<16x128xf32>
    %c0_6 = arith.constant 0 : index
    %c0_7 = arith.constant 0 : index
    %8 = vector.load %arg4[%c0_6, %c0_7] : memref<128x128xf32, #tpu.memory_space<vmem>>, vector<128x128xf32>
    %cst_8 = arith.constant dense<0.000000e+00> : vector<16x128xf32>
    %9 = tpu.matmul %7, %8, %cst_8 {dimension_numbers = #tpu.dot_dimension_numbers<[1], [0], [0], [1], [0, 0, 1, 1], [], []>} : vector<16x128xf32>, vector<128x128xf32>, vector<16x128xf32> -> vector<16x128xf32>
    %c0_9 = arith.constant 0 : index
    %c0_10 = arith.constant 0 : index
    %10 = vector.load %arg5[%c0_9, %c0_10] : memref<1x128xf32, #tpu.memory_space<vmem>>, vector<1x128xf32>
    %11 = vector.broadcast %10 : vector<1x128xf32> to vector<16x128xf32>
    %12 = arith.addf %9, %11 : vector<16x128xf32>
    %cst_11 = arith.constant dense<0xFF800000> : vector<16xf32>
    %13 = vector.multi_reduction <maximumf>, %12, %cst_11 [1] : vector<16x128xf32> to vector<16xf32>
    %14 = vector.shape_cast %13 : vector<16xf32> to vector<16x1xf32>
    %15 = vector.broadcast %14 : vector<16x1xf32> to vector<16x128xf32>
    %16 = arith.subf %12, %15 : vector<16x128xf32>
    %17 = math.exp %16 : vector<16x128xf32>
    %cst_12 = arith.constant dense<0.000000e+00> : vector<16xf32>
    %18 = vector.multi_reduction <add>, %17, %cst_12 [1] : vector<16x128xf32> to vector<16xf32>
    %19 = vector.shape_cast %18 : vector<16xf32> to vector<16x1xf32>
    %20 = tpu.reciprocal %19 : vector<16x1xf32> -> vector<16x1xf32>
    %21 = vector.broadcast %20 : vector<16x1xf32> to vector<16x128xf32>
    %22 = arith.mulf %17, %21 : vector<16x128xf32>
    %23 = vector.extract_strided_slice %22 {offsets = [0, 0], sizes = [16, 8], strides = [1, 1]} : vector<16x128xf32> to vector<16x8xf32>
    %c0_13 = arith.constant 0 : index
    %c0_14 = arith.constant 0 : index
    %24 = vector.load %arg6[%c0_13, %c0_14] : memref<16x8xf32, #tpu.memory_space<vmem>>, vector<16x8xf32>
    tpu.vector_store %arg6[%c0_13, %c0_14], %23 {strides = array<i32>} : memref<16x8xf32, #tpu.memory_space<vmem>>, vector<16x8xf32>,
    return
  }
  func.func @transform_0(%arg0: i32) -> (i32, i32) {
    %c0_i32 = arith.constant 0 : i32
    %c0_i32_0 = arith.constant 0 : i32
    return %arg0, %c0_i32 : i32, i32
  }
  func.func @transform_1(%arg0: i32) -> (i32, i32) {
    %c0_i32 = arith.constant 0 : i32
    %c0_i32_0 = arith.constant 0 : i32
    %c0_i32_1 = arith.constant 0 : i32
    return %c0_i32, %c0_i32_0 : i32, i32
  }
  func.func @transform_2(%arg0: i32) -> (i32, i32) {
    %c0_i32 = arith.constant 0 : i32
    %c0_i32_0 = arith.constant 0 : i32
    %c0_i32_1 = arith.constant 0 : i32
    return %c0_i32, %c0_i32_0 : i32, i32
  }
  func.func @transform_3(%arg0: i32) -> (i32, i32) {
    %c0_i32 = arith.constant 0 : i32
    %c0_i32_0 = arith.constant 0 : i32
    %c0_i32_1 = arith.constant 0 : i32
    return %c0_i32, %c0_i32_0 : i32, i32
  }
  func.func @transform_4(%arg0: i32) -> (i32, i32) {
    %c0_i32 = arith.constant 0 : i32
    %c0_i32_0 = arith.constant 0 : i32
    %c0_i32_1 = arith.constant 0 : i32
    return %c0_i32, %c0_i32_0 : i32, i32
  }
  func.func @transform_5(%arg0: i32) -> (i32, i32) {
    %c0_i32 = arith.constant 0 : i32
    %c0_i32_0 = arith.constant 0 : i32
    return %arg0, %c0_i32 : i32, i32
  }
}

</mosaic_0001>

<bundles_post_ra>
// kernel: tpu_custom_call.1
= control target key start
LH: loop header
LB: loop body
LE: loop exit
PB: predicated region body
PF: predicated region fallthrough
CT: control target
= control target key end

     0   :  { %10 = vsyncpa [#allocation3], 0  ;;  %s741_s18 = smov 0   ;;  %s816_s0 = inlined_call_operand.vmem [shape: f32[32,4], index: 0, kind: input, shape index: {}]   ;;  %s817_s1 = inlined_call_operand.vmem [shape: f32[4,128], index: 1, kind: input, shape index: {}]   ;;  %s818_s2 = inlined_call_operand.vmem [shape: f32[1,128], index: 2, kind: input, shape index: {}]   ;;  %s819_s3 = inlined_call_operand.hbm [shape: f32[128,128], index: 3, kind: input, shape index: {}]   ;;  %s820_s4 = inlined_call_operand.vmem [shape: f32[1,128], index: 4, kind: input, shape index: {}]   ;;  %s821_s5 = inlined_call_operand.vmem [shape: f32[32,8], index: 5, kind: output, shape index: {}]  }
   0x1 LB: > { %s528_s19 = sadd.s32 4294967295, %s706_s18   ;;  %p530_p0 = scmp.ge.s32.totalorder %s706_s18, 1  ;;  %s706_s18 = sphi %s741_s18, %s16_s18  }
   0x2   : > { %p157_p1 = scmp.lt.s32.totalorder %s706_s18, 3  ;;  %s708_s20 = smov [#allocation2]  }
   0x3   : > { %s175_s21 = sshll.u32 %s708_s20, 4  ;;  %p755_p3 = scmp.eq.s32.totalorder %s528_s19, 0  ;;  %s176_s21 = int_to_ptr.vmem [resolvable:$true] %s175_s21 }
   0x4   : > { %p749_p2 = pnand %p530_p0, %p157_p1  ;;  %s668_s27 = scalar_lea.hbm %s819_s3, 2048 }
   0x5   : > { %s826_s23 = scalar_select %p755_p3, 1, 0 }
   0x6   : > { %s825_s22 = scalar_select %p749_p2, 1, 0 }
   0x7   : > { %p643_p4 = pneg %p749_p2  ;;  %p669_p6 = scmp.ne.s32.totalorder %s819_s3, %s668_s27 }
   0x8   : > { %p675_p10 = scmp.lt.u32.totalorder %s668_s27, %s819_s3 }
   0x9   : > { %p763_p5 = pnand %p755_p3, %p643_p4 }
   0xb   : > { %p670_p7 = pneg %p763_p5 }
   0xd   : > { %p671_p8 = pnand %p670_p7, %p669_p6 }
   0xf   : > { %p672_p9 = pneg %p671_p8 }
  0x11   : > { %p677_p11 = pnand %p675_p10, %p672_p9 }
  0x13   : > { %680 = shalt.err (!%p677_p11)
}
  0x14   : > { %s681_s7 = scalar_lea.vmem %s176_s21, 2048  ;;  %p689_p1 = scmp.lt.s32.totalorder %s176_s21, %s176_s21 }
  0x15   : > { %p682_p12 = scmp.ne.s32.totalorder %s176_s21, %s681_s7  ;;  %p690_p4 = scmp.lt.s32.totalorder %s681_s7, %s681_s7 }
  0x17   : > { %p684_p13 = pnand %p682_p12, %p670_p7  ;;  %p691_p3 = por %p690_p4, %p689_p1 }
  0x19   : > { %p685_p0 = pneg %p684_p13 }
  0x1b   : > { %p692_p2 = pnand %p691_p3, %p685_p0 }
  0x1d   : > { %695 = shalt.err (!%p692_p2)
}
  0x1e   : > { %s709_s8 = smov 128   ;;  %s710_s9 = smov 8  }
  0x1f   : > { %646 = dma.hbm_to_vmem [thread:$0]  (!%p763_p5), %s819_s3, 2048, %s176_s21, [#allocation3], %s709_s8, %s709_s8, %s710_s9  }
  0x20   : > { %p828_p6 = scmp.ne.s32.totalorder %s825_s22, 0 }
  0x21   : > { %p829_p8 = scmp.ne.s32.totalorder (!%p828_p6), %s826_s23, 0 }
  0x22   : > { %203 = sbr.rel (%p828_p6) target bundleno = 800 (0x320), region = 40 }
  0x29   : > { %701 = dma.done.wait (%p829_p8), [#allocation3], 2048  }
  0x2a   : > { %703 = vsyncadd (%p829_p8), [#allocation3], 4294965248  ;;  %s535_s12 = sshll.u32 %s528_s19, 1  ;;  %vm260_vm0 = vcmask 1043456   ;;  %vm253_vm1 = vcmask 31744   ;;  %v341_v3 = vld [vmem:[#allocation2] sm:$0xff] }
  0x2b   : > { %p232_p2 = scmp.lt.s32.totalorder %s535_s12, 3  ;;  %v245_v0 = vld [vmem:[%s817_s1] sm:$0xf]  ;;  %v342_v4 = vld [vmem:[#allocation2 + $0x8] sm:$0xff]  ;;  %v343_v5 = vld [vmem:[#allocation2 + $0x10] sm:$0xff]  ;;  %vm457_vm2 = vcmask 64512  }
  0x2c   : > { %567 = vmatprep.subr.msk.mxu0 %vm260_vm0, %v245_v0  ;;  %v607_v6 = vpack.c.bf16 %v342_v4, %v341_v3  ;;  %v344_v7 = vld [vmem:[#allocation2 + $0x18] sm:$0xff]  ;;  %v345_v9 = vld [vmem:[#allocation2 + $0x20] sm:$0xff]  ;;  %v346_v10 = vld [vmem:[#allocation2 + $0x28] sm:$0xff] }
  0x2d   : > { %s831_s12 = smov (!%p232_p2, %s535_s12), 3  ;;  %568 = vmatpush3.msk.msra.mxu0 %vm260_vm0, %v245_v0  ;;  %v611_v8 = vpack.c.bf16 %v344_v7, %v343_v5  ;;  %v615_v11 = vpack.c.bf16 %v346_v10, %v345_v9  ;;  %v347_v12 = vld [vmem:[#allocation2 + $0x30] sm:$0xff]  ;;  %v348_v13 = vld [vmem:[#allocation2 + $0x38] sm:$0xff]  ;;  %v349_v15 = vld [vmem:[#allocation2 + $0x40] sm:$0xff] }
  0x2e   : > { %s536_s13 = sshll.u32 %s831_s12, 3  ;;  %608 = vmatprep.subr.bf16.mxu1 %v607_v6  ;;  %v619_v14 = vpack.c.bf16 %v348_v13, %v347_v12  ;;  %v350_v16 = vld [vmem:[#allocation2 + $0x48] sm:$0xff]  ;;  %v351_v18 = vld [vmem:[#allocation2 + $0x50] sm:$0xff]  ;;  %v352_v19 = vld [vmem:[#allocation2 + $0x58] sm:$0xff] }
  0x2f   : > { %s235_s16 = scalar_lea.vmem %s816_s0, %s536_s13  ;;  %610 = vmatpush3.bf16.msra.mxu1 %v607_v6  ;;  %v623_v17 = vpack.c.bf16 %v350_v16, %v349_v15  ;;  %v627_v20 = vpack.c.bf16 %v352_v19, %v351_v18  ;;  %v353_v21 = vld [vmem:[#allocation2 + $0x60] sm:$0xff]  ;;  %v354_v22 = vld [vmem:[#allocation2 + $0x68] sm:$0xff]  ;;  %v355_v24 = vld [vmem:[#allocation2 + $0x70] sm:$0xff]  ;;  %s241_s26 = scalar_lea.vmem %s821_s5, %s536_s13 }
  0x30   : > { %v243_v1 = vld [vmem:[%s235_s16] sm:$0xff]  ;;  %v244_v2 = vld [vmem:[%s235_s16 + $0x8] sm:$0xff]  ;;  %612 = vmatprep.subr.bf16.mxu1 %v611_v8  ;;  %v631_v23 = vpack.c.bf16 %v354_v22, %v353_v21  ;;  %v356_v25 = vld [vmem:[#allocation2 + $0x78] sm:$0xff] }
  0x31   : > { %569 = vmatprep.mubr.msk.f32.mxu0 %vm253_vm1, %v243_v1  ;;  %v635_v26 = vpack.c.bf16 %v356_v25, %v355_v24  ;;  %v539_v27 = vld [vmem:[%s818_s2] ss:$0 sm:$0xff] }
  0x32   : > { %570 = vmatmul.mubr.msk.f32.vlgmr.msra.gmra.mrb[0].mxu0 %vm253_vm1, %v244_v2  ;;  %v543_v34 = vld [vmem:[%s820_s4] ss:$0 sm:$0xff] }
  0x33   : > { %614 = vmatpush3.bf16.msra.mxu1 %v611_v8 }
  0x34   : > { %616 = vmatprep.subr.bf16.mxu1 %v615_v11 }
  0x37   : > { %618 = vmatpush3.bf16.msra.mxu1 %v615_v11 }
  0x38   : > { %620 = vmatprep.subr.bf16.mxu1 %v619_v14 }
  0x3b   : > { %622 = vmatpush3.bf16.msra.mxu1 %v619_v14 }
  0x3c   : > { %624 = vmatprep.subr.bf16.mxu1 %v623_v17 }
  0x3f   : > { %626 = vmatpush3.bf16.msra.mxu1 %v623_v17 }
  0x40   : > { %628 = vmatprep.subr.bf16.mxu1 %v627_v20 }
  0x43   : > { %630 = vmatpush3.bf16.msra.mxu1 %v627_v20 }
  0x44   : > { %632 = vmatprep.subr.bf16.mxu1 %v631_v23 }
  0x47   : > { %634 = vmatpush3.bf16.msra.mxu1 %v631_v23 }
  0x48   : > { %636 = vmatprep.subr.bf16.mxu1 %v635_v26 }
  0x4b   : > { %638 = vmatpush3.bf16.msra.mxu1 %v635_v26 }
 0x105   : > { %v571_v28 = vpop.f32.mrb[0].mxu0 }
 0x106   : > { %v336_v29 = vadd.f32 %v571_v28, %v539_v27  ;;  %v330_v30 = vpop.f32.mrb[1].mxu0 }
 0x107   : > { %v331_v31 = vadd.f32 %v539_v27, %v330_v30 }
 0x108   : > { %v340_v33 = vmax.f32 %v336_v29, 0.0 }
 0x109   : > { %v339_v32 = vmax.f32 %v331_v31, 0.0 }
 0x10b   : > { %604 = vmatprep.mubr.f32.mxu1 %v339_v32 }
 0x10c   : > { %605 = vmatmul.mubr.f32.vlgmr.msra.gmra.mrb[0].mxu1 %v340_v33 }
 0x1df   : > { %v606_v35 = vpop.f32.mrb[0].mxu1 }
 0x1e0   : > { %v430_v36 = vpop.f32.mrb[1].mxu1  ;;  %v436_v38 = vadd.f32 %v606_v35, %v543_v34 }
 0x1e1   : > { %v431_v37 = vadd.f32 %v543_v34, %v430_v36 }
 0x1e3   : > { %439 = vmax.xlane.f32.xlu0 %v431_v37 }
 0x1e7   : > { %441 = vmax.xlane.f32.xlu0 %v436_v38 }
 0x270   : > { %v440_v39 = vpop.xlane.xlu0 %439 }
 0x271   : > { %v443_v40 = vsub.f32 %v431_v37, %v440_v39 }
 0x273   : > { %v445_v41 = vmul.f32 1.442695, %v443_v40 }
 0x274   : > { %v442_v42 = vpop.xlane.xlu0 %441 }
 0x275   : > { %660 = vpow2.f32 %v445_v41  ;;  %v444_v43 = vsub.f32 %v436_v38, %v442_v42 }
 0x277   : > { %v447_v44 = vmul.f32 1.442695, %v444_v43 }
 0x279   : > { %662 = vpow2.f32 %v447_v44 }
 0x27f   : > { %v661_v45 = vpop.eup %660 }
 0x280   : > { %449 = vadd.xlane.f32.xlu1 %v661_v45 }
 0x283   : > { %v663_v46 = vpop.eup %662 }
 0x284   : > { %451 = vadd.xlane.f32.xlu1 %v663_v46 }
 0x30d   : > { %v450_v47 = vpop.xlane.xlu1 %449 }
 0x30e   : > { %664 = vrcp.f32 %v450_v47 }
 0x311   : > { %v452_v48 = vpop.xlane.xlu1 %451 }
 0x312   : > { %666 = vrcp.f32 %v452_v48 }
 0x318   : > { %v665_v49 = vpop.eup %664 }
 0x319   : > { %v455_v50 = vmul.f32 %v665_v49, %v661_v45 }
 0x31b   : > { %458 = vst.msk [vmem:[%s241_s26] sm:$0xff] %vm457_vm2, %v455_v50 }
 0x31c   : > { %v667_v51 = vpop.eup %666 }
 0x31d   : > { %v456_v52 = vmul.f32 %v667_v51, %v663_v46 }
 0x31f   : > { %459 = vst.msk [vmem:[%s241_s26 + $0x8] sm:$0xff] %vm457_vm2, %v456_v52 }
 0x320 PF: > { %s16_s18 = sadd.s32 1, %s706_s18  }
 0x321   : > { %p13_p3 = scmp.ge.s32.totalorder %s16_s18, 4  }
 0x323   :  { %15 = sbr.rel (!%p13_p3) target bundleno = 1 (0x1), region = 75 }
 0x32a   :  { %482 = vsyncpa [#allocation3], 1 }
 0x32b   :  { %484 = vsyncpa [#allocation3 + $0x1], 1 }

</bundles_post_ra>
